<compile_context>
chip_gen: v7x
topology: tpu7x:2x2x1
jax: 0.10.0
libtpu: 0.0.40
codegen_flags: <defaults>
</compile_context>

<pallas_src>
import functools

import jax
import jax.numpy as jnp
from jax.experimental import pallas as pl
from jax.experimental.pallas import tpu as pltpu


def _round_up(n, m):
    return ((n + m - 1) // m) * m


def core_kernel(x_ref, wqkv_ref, bqkv_ref, w1_ref, b1_ref, w2_ref, b2_ref,
                o_ref, *, inv_scale):
    tb, s, d_in = x_ref.shape
    dp = wqkv_ref.shape[0]          # lane-padded model dim
    d_out = o_ref.shape[2]

    x3 = x_ref[...]                                        # (TB, S, D) f32
    if d_in != dp:
        # Zero padding of the feature dim is exact: padded weight rows/cols and
        # bias entries are zero, so all padded lanes stay identically zero.
        x3 = jnp.pad(x3, ((0, 0), (0, 0), (0, dp - d_in)))
    x2 = x3.reshape(tb * s, dp)                            # S multiple of 8 -> free
    xb = x2.astype(jnp.bfloat16)

    # Fused QKV projection: one bf16 MXU matmul, f32 accumulation, f32 bias add.
    # 1/sqrt(D) (original, unpadded D) is folded into q instead of dividing scores.
    qkv = (jnp.dot(xb, wqkv_ref[...], preferred_element_type=jnp.float32)
           + bqkv_ref[...])
    q = (qkv[:, :dp] * inv_scale).reshape(tb, s, dp).astype(jnp.bfloat16)
    k = qkv[:, dp:2 * dp].reshape(tb, s, dp).astype(jnp.bfloat16)
    v = qkv[:, 2 * dp:].reshape(tb, s, dp).astype(jnp.bfloat16)

    # Attention scores: transposed contraction expressed directly (no k.T copy).
    scores = jnp.einsum("bqd,bkd->bqk", q, k,
                        preferred_element_type=jnp.float32)

    # Numerically-stable softmax in f32; normalize on the otherwise-idle EUP slot.
    m = jnp.max(scores, axis=-1, keepdims=True)
    e = jnp.exp(scores - m)
    p = e * pl.reciprocal(jnp.sum(e, axis=-1, keepdims=True), approx=True)

    a = jnp.einsum("bqk,bkd->bqd", p.astype(jnp.bfloat16), v,
                   preferred_element_type=jnp.float32)

    o3 = x3 + a                                            # residual 1 (f32)
    o2 = o3.reshape(tb * s, dp)

    # Feed-forward: D -> DF -> D, bf16 MXU matmuls with f32 accumulation.
    h = jnp.dot(o2.astype(jnp.bfloat16), w1_ref[...],
                preferred_element_type=jnp.float32) + b1_ref[...]
    h = jnp.maximum(h, 0.0)                                # ReLU
    f = jnp.dot(h.astype(jnp.bfloat16), w2_ref[...],
                preferred_element_type=jnp.float32) + b2_ref[...]

    y = (o2 + f).reshape(tb, s, dp)                        # residual 2
    if d_out != dp:
        y = y[:, :, :d_out]                                # emit at original D width
    o_ref[...] = y.astype(o_ref.dtype)


def prepare_params(params):
    """One-time weight prep: pad feature dims to 128 lanes, fuse QKV, cast bf16.

    Do this once and reuse the result across every call of the looped module so
    the per-call HBM traffic is only x/out + the (already bf16, padded) weights.
    """
    D = params["wq"].shape[0]
    DF = params["w1"].shape[1]
    Dp = _round_up(D, 128)
    DFp = _round_up(DF, 128)

    def padw(w, rows, cols):
        return jnp.pad(w, ((0, rows - w.shape[0]),
                           (0, cols - w.shape[1]))).astype(jnp.bfloat16)

    def padb(b, cols):
        return jnp.pad(b, ((0, 0), (0, cols - b.shape[1])))       # stays f32

    wqkv = jnp.concatenate([padw(params["wq"], Dp, Dp),
                            padw(params["wk"], Dp, Dp),
                            padw(params["wv"], Dp, Dp)], axis=1)  # (Dp, 3*Dp)
    bqkv = jnp.concatenate([padb(params["bq"], Dp),
                            padb(params["bk"], Dp),
                            padb(params["bv"], Dp)], axis=1)      # (1, 3*Dp)
    w1 = padw(params["w1"], Dp, DFp)
    b1 = padb(params["b1"], DFp)
    w2 = padw(params["w2"], DFp, Dp)
    b2 = padb(params["b2"], Dp)

    return dict(wqkv=wqkv, bqkv=bqkv, w1=w1, b1=b1, w2=w2, b2=b2,
                d_model=D, d_ff=DF, d_pad=Dp, df_pad=DFp)


def core_forward(x, prepped):
    B, S, D = x.shape
    assert D == prepped["d_model"]
    Dp, DFp, DF = prepped["d_pad"], prepped["df_pad"], prepped["d_ff"]

    # Batch tile: target ~512 rows per step (amortize grid overhead, fill MXU M),
    # but keep the grid >= 2 steps whenever B >= 2 so both v7x TensorCores work.
    tb = max(1, min(B, 512 // max(1, S)))
    if B >= 2:
        tb = max(1, min(tb, B // 2))
    while B % tb:
        tb -= 1

    def const_spec(shape):
        # Constant across the grid: single-buffer (no re-DMA, half the VMEM).
        return pl.BlockSpec(shape, lambda b: (0, 0), pipeline_mode=pl.Buffered(1))

    kernel = functools.partial(core_kernel, inv_scale=1.0 / (D ** 0.5))

    # VMEM budget: x/out double-buffered, weights single-buffered, plus the
    # f32/bf16 intermediates; 2x headroom, clamped to v7x's 64 MiB physical.
    rows = tb * S
    est = (4 * tb * S * D * 4                      # in + out blocks (double-buffered)
           + 2 * (3 * Dp * Dp + 2 * Dp * DFp)      # bf16 weights (single-buffered)
           + (4 * Dp + DFp) * 4                    # f32 biases
           + rows * (8 * Dp + 2 * DFp) * 4         # qkv/q/k/v/a/o/h/f activations
           + 2 * tb * S * S * 4)                   # scores + exp
    vmem_limit = int(min(64 * 2 ** 20, max(32 * 2 ** 20, 2 * est)))

    cost = pl.CostEstimate(
        flops=2 * B * S * (3 * D * D + 2 * S * D + 2 * D * DF),
        transcendentals=B * S * S,
        bytes_accessed=2 * B * S * D * 4 + 2 * (3 * Dp * Dp + 2 * Dp * DFp)
                       + (4 * Dp + DFp) * 4,
    )

    return pl.pallas_call(
        kernel,
        out_shape=jax.ShapeDtypeStruct((B, S, D), x.dtype),
        grid=(B // tb,),
        in_specs=[
            pl.BlockSpec((tb, S, D), lambda b: (b, 0, 0)),        # x (unpadded)
            const_spec((Dp, 3 * Dp)), const_spec((1, 3 * Dp)),    # fused Wqkv, bqkv
            const_spec((Dp, DFp)),    const_spec((1, DFp)),       # W1, b1
            const_spec((DFp, Dp)),    const_spec((1, Dp)),        # W2, b2
        ],
        out_specs=pl.BlockSpec((tb, S, D), lambda b: (b, 0, 0)),
        compiler_params=pltpu.CompilerParams(
            dimension_semantics=("parallel",),
            vmem_limit_bytes=vmem_limit),
        cost_estimate=cost,
    )(x, prepped["wqkv"], prepped["bqkv"], prepped["w1"], prepped["b1"],
      prepped["w2"], prepped["b2"])


def core_reference(x, p):
    # Pure-JAX (f32) reference for correctness checking.
    q = x @ p["wq"] + p["bq"]
    k = x @ p["wk"] + p["bk"]
    v = x @ p["wv"] + p["bv"]
    scores = jnp.einsum("bqd,bkd->bqk", q, k) / (q.shape[-1] ** 0.5)
    w = jax.nn.softmax(scores, axis=-1)
    a = jnp.einsum("bqk,bkd->bqd", w, v)
    o = x + a
    f = jnp.maximum(o @ p["w1"] + p["b1"], 0.0) @ p["w2"] + p["b2"]
    return o + f


def init_params(key, d_model, d_ff):
    ks = jax.random.split(key, 10)

    def lin(kw, kb, din, dout):
        bound = 1.0 / (din ** 0.5)   # torch.nn.Linear default init range
        w = jax.random.uniform(kw, (din, dout), jnp.float32, -bound, bound)
        b = jax.random.uniform(kb, (1, dout), jnp.float32, -bound, bound)
        return w, b

    wq, bq = lin(ks[0], ks[1], d_model, d_model)
    wk, bk = lin(ks[2], ks[3], d_model, d_model)
    wv, bv = lin(ks[4], ks[5], d_model, d_model)
    w1, b1 = lin(ks[6], ks[7], d_model, d_ff)
    w2, b2 = lin(ks[8], ks[9], d_ff, d_model)
    return dict(wq=wq, bq=bq, wk=wk, bk=bk, wv=wv, bv=bv,
                w1=w1, b1=b1, w2=w2, b2=b2)


if __name__ == "__main__":
    B, S, D, DF = 2, 8, 32, 64
    key = jax.random.PRNGKey(0)
    kx, kp = jax.random.split(key)
    x = jax.random.normal(kx, (B, S, D), jnp.float32)
    params = init_params(kp, D, DF)

    prepped = prepare_params(params)       # one-time weight pad/fuse/bf16 cast
    out = core_forward(x, prepped)
    out = jax.block_until_ready(out)

    ref = core_reference(x, params)
    assert out.shape == (B, S, D)
    # bf16 MXU matmuls (f32 accumulation) + approx softmax reciprocal ->
    # loosened tolerance vs the f32 reference.
    assert jnp.allclose(out, ref, atol=5e-2, rtol=5e-2), "mismatch vs JAX reference"

    # TODO(synk): norm_first / dropout branches are disabled by default in the
    # PyTorch module (None), so LayerNorm/Dropout are intentionally not emitted.
    print("KERNEL_OK")
</pallas_src>

<mosaic_0001>
module attributes {stable_mosaic.version = 11 : i64} {
  func.func @core_kernel(%arg0: i32, %arg1: memref<1x8x32xf32, #tpu.memory_space<vmem>>, %arg2: memref<128x384xbf16, #tpu.memory_space<vmem>>, %arg3: memref<1x384xf32, #tpu.memory_space<vmem>>, %arg4: memref<128x128xbf16, #tpu.memory_space<vmem>>, %arg5: memref<1x128xf32, #tpu.memory_space<vmem>>, %arg6: memref<128x128xbf16, #tpu.memory_space<vmem>>, %arg7: memref<1x128xf32, #tpu.memory_space<vmem>>, %arg8: memref<1x8x32xf32, #tpu.memory_space<vmem>>) attributes {dimension_semantics = [#tpu.dimension_semantics<parallel>], iteration_bounds = array<i64: 2>, scalar_prefetch = 0 : i64, scratch_operands = 0 : i64, tpu.core_type = #tpu.core_type<tc>, window_params = [{transform_indices = @transform_0, window_bounds = array<i64: 1, 8, 32>}, {pipeline_mode = #tpu.pipeline_mode<synchronous>, transform_indices = @transform_1, window_bounds = array<i64: 128, 384>}, {pipeline_mode = #tpu.pipeline_mode<synchronous>, transform_indices = @transform_2, window_bounds = array<i64: 1, 384>}, {pipeline_mode = #tpu.pipeline_mode<synchronous>, transform_indices = @transform_3, window_bounds = array<i64: 128, 128>}, {pipeline_mode = #tpu.pipeline_mode<synchronous>, transform_indices = @transform_4, window_bounds = array<i64: 1, 128>}, {pipeline_mode = #tpu.pipeline_mode<synchronous>, transform_indices = @transform_5, window_bounds = array<i64: 128, 128>}, {pipeline_mode = #tpu.pipeline_mode<synchronous>, transform_indices = @transform_6, window_bounds = array<i64: 1, 128>}, {transform_indices = @transform_7, window_bounds = array<i64: 1, 8, 32>}]} {
    %c0 = arith.constant 0 : index
    %c0_0 = arith.constant 0 : index
    %c0_1 = arith.constant 0 : index
    %0 = vector.load %arg1[%c0, %c0_0, %c0_1] : memref<1x8x32xf32, #tpu.memory_space<vmem>>, vector<1x8x32xf32>
    %c0_i32 = arith.constant 0 : i32
    %1 = arith.sitofp %c0_i32 : i32 to f32
    %2 = vector.broadcast %1 : f32 to vector<1x8x96xf32>
    %3 = tpu.concatenate %0, %2 in 2 : vector<1x8x32xf32>, vector<1x8x96xf32> -> vector<1x8x128xf32>
    %4 = vector.shape_cast %3 : vector<1x8x128xf32> to vector<8x128xf32>
    %5 = arith.truncf %4 : vector<8x128xf32> to vector<8x128xbf16>
    %c0_2 = arith.constant 0 : index
    %c0_3 = arith.constant 0 : index
    %6 = vector.load %arg2[%c0_2, %c0_3] : memref<128x384xbf16, #tpu.memory_space<vmem>>, vector<128x384xbf16>
    %cst = arith.constant dense<0.000000e+00> : vector<8x384xf32>
    %7 = tpu.matmul %5, %6, %cst {dimension_numbers = #tpu.dot_dimension_numbers<[1], [0], [0], [1], [0, 0, 1, 1], [], []>} : vector<8x128xbf16>, vector<128x384xbf16>, vector<8x384xf32> -> vector<8x384xf32>
    %c0_4 = arith.constant 0 : index
    %c0_5 = arith.constant 0 : index
    %8 = vector.load %arg3[%c0_4, %c0_5] : memref<1x384xf32, #tpu.memory_space<vmem>>, vector<1x384xf32>
    %9 = vector.broadcast %8 : vector<1x384xf32> to vector<8x384xf32>
    %10 = arith.addf %7, %9 : vector<8x384xf32>
    %11 = vector.extract_strided_slice %10 {offsets = [0, 0], sizes = [8, 128], strides = [1, 1]} : vector<8x384xf32> to vector<8x128xf32>
    %cst_6 = arith.constant 0.176776692 : f32
    %12 = vector.broadcast %cst_6 : f32 to vector<8x128xf32>
    %13 = arith.mulf %11, %12 : vector<8x128xf32>
    %14 = vector.shape_cast %13 : vector<8x128xf32> to vector<1x8x128xf32>
    %15 = arith.truncf %14 : vector<1x8x128xf32> to vector<1x8x128xbf16>
    %16 = vector.extract_strided_slice %10 {offsets = [0, 128], sizes = [8, 128], strides = [1, 1]} : vector<8x384xf32> to vector<8x128xf32>
    %17 = vector.shape_cast %16 : vector<8x128xf32> to vector<1x8x128xf32>
    %18 = arith.truncf %17 : vector<1x8x128xf32> to vector<1x8x128xbf16>
    %19 = vector.extract_strided_slice %10 {offsets = [0, 256], sizes = [8, 128], strides = [1, 1]} : vector<8x384xf32> to vector<8x128xf32>
    %20 = vector.shape_cast %19 : vector<8x128xf32> to vector<1x8x128xf32>
    %21 = arith.truncf %20 : vector<1x8x128xf32> to vector<1x8x128xbf16>
    "tpu.trace_start"() <{level = 10 : i32, message = "bqd,bkd->bqk"}> : () -> ()
    %cst_7 = arith.constant dense<0.000000e+00> : vector<1x8x8xf32>
    %22 = tpu.matmul %15, %18, %cst_7 {dimension_numbers = #tpu.dot_dimension_numbers<[2], [2], [1], [1], [0, 0, 0, 1, 1, 1], [0], [0]>} : vector<1x8x128xbf16>, vector<1x8x128xbf16>, vector<1x8x8xf32> -> vector<1x8x8xf32>
    "tpu.trace_stop"() : () -> ()
    %cst_8 = arith.constant dense<0xFF800000> : vector<1x8xf32>
    %23 = vector.multi_reduction <maximumf>, %22, %cst_8 [2] : vector<1x8x8xf32> to vector<1x8xf32>
    %24 = vector.shape_cast %23 : vector<1x8xf32> to vector<1x8x1xf32>
    %25 = vector.broadcast %24 : vector<1x8x1xf32> to vector<1x8x8xf32>
    %26 = arith.subf %22, %25 : vector<1x8x8xf32>
    %27 = math.exp %26 : vector<1x8x8xf32>
    %cst_9 = arith.constant dense<0.000000e+00> : vector<1x8xf32>
    %28 = vector.multi_reduction <add>, %27, %cst_9 [2] : vector<1x8x8xf32> to vector<1x8xf32>
    %29 = vector.shape_cast %28 : vector<1x8xf32> to vector<1x8x1xf32>
    %30 = tpu.reciprocal %29 {approx = true} : vector<1x8x1xf32> -> vector<1x8x1xf32>
    %31 = vector.broadcast %30 : vector<1x8x1xf32> to vector<1x8x8xf32>
    %32 = arith.mulf %27, %31 : vector<1x8x8xf32>
    %33 = arith.truncf %32 : vector<1x8x8xf32> to vector<1x8x8xbf16>
    "tpu.trace_start"() <{level = 10 : i32, message = "bqk,bkd->bqd"}> : () -> ()
    %cst_10 = arith.constant dense<0.000000e+00> : vector<1x8x128xf32>
    %34 = tpu.matmul %33, %21, %cst_10 {dimension_numbers = #tpu.dot_dimension_numbers<[2], [1], [1], [2], [0, 0, 0, 1, 1, 2], [0], [0]>} : vector<1x8x8xbf16>, vector<1x8x128xbf16>, vector<1x8x128xf32> -> vector<1x8x128xf32>
    "tpu.trace_stop"() : () -> ()
    %35 = arith.addf %3, %34 : vector<1x8x128xf32>
    %36 = vector.shape_cast %35 : vector<1x8x128xf32> to vector<8x128xf32>
    %37 = arith.truncf %36 : vector<8x128xf32> to vector<8x128xbf16>
    %c0_11 = arith.constant 0 : index
    %c0_12 = arith.constant 0 : index
    %38 = vector.load %arg4[%c0_11, %c0_12] : memref<128x128xbf16, #tpu.memory_space<vmem>>, vector<128x128xbf16>
    %cst_13 = arith.constant dense<0.000000e+00> : vector<8x128xf32>
    %39 = tpu.matmul %37, %38, %cst_13 {dimension_numbers = #tpu.dot_dimension_numbers<[1], [0], [0], [1], [0, 0, 1, 1], [], []>} : vector<8x128xbf16>, vector<128x128xbf16>, vector<8x128xf32> -> vector<8x128xf32>
    %c0_14 = arith.constant 0 : index
    %c0_15 = arith.constant 0 : index
    %40 = vector.load %arg5[%c0_14, %c0_15] : memref<1x128xf32, #tpu.memory_space<vmem>>, vector<1x128xf32>
    %41 = vector.broadcast %40 : vector<1x128xf32> to vector<8x128xf32>
    %42 = arith.addf %39, %41 : vector<8x128xf32>
    %cst_16 = arith.constant 0.000000e+00 : f32
    %43 = vector.broadcast %cst_16 : f32 to vector<8x128xf32>
    %44 = arith.maximumf %42, %43 : vector<8x128xf32>
    %45 = arith.truncf %44 : vector<8x128xf32> to vector<8x128xbf16>
    %c0_17 = arith.constant 0 : index
    %c0_18 = arith.constant 0 : index
    %46 = vector.load %arg6[%c0_17, %c0_18] : memref<128x128xbf16, #tpu.memory_space<vmem>>, vector<128x128xbf16>
    %cst_19 = arith.constant dense<0.000000e+00> : vector<8x128xf32>
    %47 = tpu.matmul %45, %46, %cst_19 {dimension_numbers = #tpu.dot_dimension_numbers<[1], [0], [0], [1], [0, 0, 1, 1], [], []>} : vector<8x128xbf16>, vector<128x128xbf16>, vector<8x128xf32> -> vector<8x128xf32>
    %c0_20 = arith.constant 0 : index
    %c0_21 = arith.constant 0 : index
    %48 = vector.load %arg7[%c0_20, %c0_21] : memref<1x128xf32, #tpu.memory_space<vmem>>, vector<1x128xf32>
    %49 = vector.broadcast %48 : vector<1x128xf32> to vector<8x128xf32>
    %50 = arith.addf %47, %49 : vector<8x128xf32>
    %51 = arith.addf %36, %50 : vector<8x128xf32>
    %52 = vector.shape_cast %51 : vector<8x128xf32> to vector<1x8x128xf32>
    %53 = vector.extract_strided_slice %52 {offsets = [0, 0, 0], sizes = [1, 8, 32], strides = [1, 1, 1]} : vector<1x8x128xf32> to vector<1x8x32xf32>
    %c0_22 = arith.constant 0 : index
    %c0_23 = arith.constant 0 : index
    %c0_24 = arith.constant 0 : index
    %54 = vector.load %arg8[%c0_22, %c0_23, %c0_24] : memref<1x8x32xf32, #tpu.memory_space<vmem>>, vector<1x8x32xf32>
    tpu.vector_store %arg8[%c0_22, %c0_23, %c0_24], %53 {strides = array<i32>} : memref<1x8x32xf32, #tpu.memory_space<vmem>>, vector<1x8x32xf32>,
    return
  }
  func.func @transform_0(%arg0: i32) -> (i32, i32, i32) {
    %c0_i32 = arith.constant 0 : i32
    %c0_i32_0 = arith.constant 0 : i32
    %c0_i32_1 = arith.constant 0 : i32
    return %arg0, %c0_i32, %c0_i32_0 : i32, i32, i32
  }
  func.func @transform_1(%arg0: i32) -> (i32, i32) {
    %c0_i32 = arith.constant 0 : i32
    %c0_i32_0 = arith.constant 0 : i32
    %c0_i32_1 = arith.constant 0 : i32
    return %c0_i32, %c0_i32_0 : i32, i32
  }
  func.func @transform_2(%arg0: i32) -> (i32, i32) {
    %c0_i32 = arith.constant 0 : i32
    %c0_i32_0 = arith.constant 0 : i32
    %c0_i32_1 = arith.constant 0 : i32
    return %c0_i32, %c0_i32_0 : i32, i32
  }
  func.func @transform_3(%arg0: i32) -> (i32, i32) {
    %c0_i32 = arith.constant 0 : i32
    %c0_i32_0 = arith.constant 0 : i32
    %c0_i32_1 = arith.constant 0 : i32
    return %c0_i32, %c0_i32_0 : i32, i32
  }
  func.func @transform_4(%arg0: i32) -> (i32, i32) {
    %c0_i32 = arith.constant 0 : i32
    %c0_i32_0 = arith.constant 0 : i32
    %c0_i32_1 = arith.constant 0 : i32
    return %c0_i32, %c0_i32_0 : i32, i32
  }
  func.func @transform_5(%arg0: i32) -> (i32, i32) {
    %c0_i32 = arith.constant 0 : i32
    %c0_i32_0 = arith.constant 0 : i32
    %c0_i32_1 = arith.constant 0 : i32
    return %c0_i32, %c0_i32_0 : i32, i32
  }
  func.func @transform_6(%arg0: i32) -> (i32, i32) {
    %c0_i32 = arith.constant 0 : i32
    %c0_i32_0 = arith.constant 0 : i32
    %c0_i32_1 = arith.constant 0 : i32
    return %c0_i32, %c0_i32_0 : i32, i32
  }
  func.func @transform_7(%arg0: i32) -> (i32, i32, i32) {
    %c0_i32 = arith.constant 0 : i32
    %c0_i32_0 = arith.constant 0 : i32
    %c0_i32_1 = arith.constant 0 : i32
    return %arg0, %c0_i32, %c0_i32_0 : i32, i32, i32
  }
}

</mosaic_0001>

<bundles_post_ra>
// kernel: tpu_custom_call.1
= control target key start
LH: loop header
LB: loop body
LE: loop exit
PB: predicated region body
PF: predicated region fallthrough
CT: control target
= control target key end

     0   :  { %s1917_s0 = inlined_call_operand.hbm [shape: f32[2,8,32], index: 0, kind: input, shape index: {}]   ;;  %s1918_s1 = inlined_call_operand.hbm [shape: bf16[128,384], index: 1, kind: input, shape index: {}]   ;;  %s1919_s2 = inlined_call_operand.vmem [shape: f32[1,384], index: 2, kind: input, shape index: {}]   ;;  %s1920_s3 = inlined_call_operand.hbm [shape: bf16[128,128], index: 3, kind: input, shape index: {}]   ;;  %s1921_s4 = inlined_call_operand.vmem [shape: f32[1,128], index: 4, kind: input, shape index: {}]   ;;  %s1922_s5 = inlined_call_operand.hbm [shape: bf16[128,128], index: 5, kind: input, shape index: {}]   ;;  %s1923_s6 = inlined_call_operand.vmem [shape: f32[1,128], index: 6, kind: input, shape index: {}]   ;;  %s1924_s7 = inlined_call_operand.hbm [shape: f32[2,8,32], index: 7, kind: output, shape index: {}]  }
   0x1   :  { %1929 = sst [smem:[#allocation16_spill]] %s1918_s1 }
   0x2   :  { %12 = vsyncpa [#allocation3], 0 }
   0x3   :  { %14 = vsyncpa [#allocation3 + $0x1], 0 }
   0x4   :  { %15 = vsyncpa [#allocation6], 0 }
   0x5   :  { %16 = vsyncpa [#allocation9], 0 }
   0x6   :  { %17 = vsyncpa [#allocation4], 0 }
   0x7   :  { %19 = vsyncpa [#allocation4 + $0x1], 0  ;;  %s1594_s24 = smov 0   ;;  %s1596_s25 = smov 0  }
   0x8   :  { %s1598_s26 = smov 0   ;;  %s1600_s27 = smov 0  }
   0x9 LB: > { %s1615_s28 = sadd.s32 4294967295, %s1540_s27   ;;  %s1046_s29 = sadd.s32 4294967294, %s1540_s27   ;;  %s1540_s27 = sphi %s1600_s27, %s1954_s27   ;;  %s1536_s26 = sphi %s1598_s26, %s1953_s26   ;;  %s1532_s25 = sphi %s1596_s25, %s1952_s25   ;;  %s1528_s24 = sphi %s1594_s24, %s1951_s24  }
   0xa   : > { %p45_p0 = scmp.ne.s32.totalorder %s1532_s25, %s1528_s24  ;;  %p1925_p1 = scmp.eq.s32.totalorder %s1615_s28, 0 }
   0xb   : > { %p201_p3 = scmp.eq.s32.totalorder %s1046_s29, 1  ;;  %p1047_p5 = scmp.ge.s32.totalorder %s1540_s27, 1 }
   0xc   : > { %p1624_p4 = por %p1925_p1, %p45_p0  ;;  %p208_p7 = scmp.lt.s32.totalorder %s1540_s27, 3 }
   0xd   : > { %p1629_p6 = por %p201_p3, %p45_p0  ;;  %s1542_s10 = smov [#allocation5]  }
   0xe   : > { %s1930_s30 = scalar_select %p1624_p4, 1, 0 }
   0xf   : > { %s1931_s8 = scalar_select %p1629_p6, 1, 0 }
  0x10   : > { %p1634_p8 = pnand %p1047_p5, %p208_p7  ;;  %s220_s11 = sshll.u32 %s1542_s10, 4  ;;  %s1638_s11 = int_to_ptr.vmem [resolvable:$true] %s220_s11 }
  0x11   : > { %1932 = sst [smem:[#allocation15_spill]] %s1931_s8  ;;  %s1543_s13 = smov [#allocation7]  }
  0x12   : > { %s1933_s9 = scalar_select %p1634_p8, 1, 0 }
  0x13   : > { %p1232_p9 = pneg %p1634_p8  ;;  %s236_s14 = sshll.u32 %s1543_s13, 4  ;;  %s1649_s14 = int_to_ptr.vmem [resolvable:$true] %s236_s14 }
  0x14   : > { %s1935_s1 = sld [smem:[#allocation16_spill]] }
  0x15   : > { %p1645_p11 = pnand %p1232_p9, %p1925_p1 }
  0x17   : > { %p1659_p13 = pneg %p1645_p11 }
  0x1a   : > { %s1352_s17 = scalar_lea.hbm %s1935_s1, 3072 }
  0x1b   : > { %p1353_p12 = scmp.ne.s32.totalorder %s1935_s1, %s1352_s17  ;;  %p1359_p5 = scmp.lt.u32.totalorder %s1352_s17, %s1935_s1 }
  0x1d   : > { %p1355_p0 = pnand %p1659_p13, %p1353_p12 }
  0x1f   : > { %p1356_p3 = pneg %p1355_p0 }
  0x21   : > { %p1361_p7 = pnand %p1359_p5, %p1356_p3 }
  0x23   : > { %1364 = shalt.err (!%p1361_p7)
}
  0x24   : > { %s1365_s23 = scalar_lea.vmem %s1638_s11, 3072  ;;  %p1373_p2 = scmp.lt.s32.totalorder %s1638_s11, %s1638_s11 }
  0x25   : > { %p1366_p9 = scmp.ne.s32.totalorder %s1638_s11, %s1365_s23  ;;  %p1374_p6 = scmp.lt.s32.totalorder %s1365_s23, %s1365_s23 }
  0x27   : > { %p1368_p10 = pnand %p1366_p9, %p1659_p13  ;;  %p1375_p12 = por %p1374_p6, %p1373_p2 }
  0x29   : > { %p1369_p1 = pneg %p1368_p10 }
  0x2b   : > { %p1376_p0 = pnand %p1375_p12, %p1369_p1 }
  0x2d   : > { %1379 = shalt.err (!%p1376_p0)
}
  0x2e   : > { %s1544_s29 = smov 192   ;;  %s1545_s10 = smov 12  }
  0x2f   : > { %1235 = dma.hbm_to_vmem [thread:$0]  (!%p1645_p11), %s1935_s1, 3072, %s1638_s11, [#allocation6], %s1544_s29, %s1544_s29, %s1545_s10  }
  0x30   : > { %s1380_s18 = scalar_lea.hbm %s1920_s3, 1024 }
  0x31   : > { %p1381_p2 = scmp.ne.s32.totalorder %s1920_s3, %s1380_s18  ;;  %p1387_p10 = scmp.lt.u32.totalorder %s1380_s18, %s1920_s3 }
  0x33   : > { %p1383_p1 = pnand %p1381_p2, %p1659_p13 }
  0x35   : > { %p1384_p6 = pneg %p1383_p1 }
  0x37   : > { %p1389_p3 = pnand %p1387_p10, %p1384_p6 }
  0x39   : > { %1392 = shalt.err (!%p1389_p3)
}
  0x3a   : > { %s1393_s11 = scalar_lea.vmem %s1649_s14, 1024  ;;  %p1401_p12 = scmp.lt.s32.totalorder %s1649_s14, %s1649_s14 }
  0x3b   : > { %p1394_p5 = scmp.ne.s32.totalorder %s1649_s14, %s1393_s11  ;;  %p1402_p0 = scmp.lt.s32.totalorder %s1393_s11, %s1393_s11 }
  0x3d   : > { %p1396_p7 = pnand %p1394_p5, %p1659_p13  ;;  %p1403_p2 = por %p1402_p0, %p1401_p12 }
  0x3f   : > { %p1397_p9 = pneg %p1396_p7 }
  0x41   : > { %p1404_p1 = pnand %p1403_p2, %p1397_p9 }
  0x43   : > { %1407 = shalt.err (!%p1404_p1)
}
  0x44   : > { %s1546_s29 = smov 64   ;;  %s1547_s10 = smov 4  }
  0x45   : > { %1238 = dma.hbm_to_vmem [thread:$0]  (!%p1645_p11), %s1920_s3, 1024, %s1649_s14, [#allocation6], %s1546_s29, %s1546_s29, %s1547_s10  }
  0x46   : > { %s1548_s16 = smov [#allocation8]   ;;  %s1704_s18 = sadd.s32 1, %s1540_s27  }
  0x47   : > { %s252_s17 = sshll.u32 %s1548_s16, 4  ;;  %s1408_s22 = scalar_lea.hbm %s1922_s5, 1024  ;;  %s253_s17 = int_to_ptr.vmem [resolvable:$true] %s252_s17 }
  0x48   : > { %p1409_p6 = scmp.ne.s32.totalorder %s1922_s5, %s1408_s22  ;;  %p1415_p5 = scmp.lt.u32.totalorder %s1408_s22, %s1922_s5 }
  0x4a   : > { %p1411_p10 = pnand %p1409_p6, %p1659_p13 }
  0x4c   : > { %p1412_p3 = pneg %p1411_p10 }
  0x4e   : > { %p1417_p7 = pnand %p1415_p5, %p1412_p3 }
  0x50   : > { %1420 = shalt.err (!%p1417_p7)
}
  0x51   : > { %s1421_s14 = scalar_lea.vmem %s253_s17, 1024  ;;  %p1429_p2 = scmp.lt.s32.totalorder %s253_s17, %s253_s17 }
  0x52   : > { %p1422_p9 = scmp.ne.s32.totalorder %s253_s17, %s1421_s14  ;;  %p1430_p1 = scmp.lt.s32.totalorder %s1421_s14, %s1421_s14 }
  0x54   : > { %p1424_p12 = pnand %p1422_p9, %p1659_p13  ;;  %p1431_p4 = por %p1430_p1, %p1429_p2 }
  0x56   : > { %p1425_p0 = pneg %p1424_p12 }
  0x58   : > { %p1432_p8 = pnand %p1431_p4, %p1425_p0 }
  0x5a   : > { %1435 = shalt.err (!%p1432_p8)
}
  0x5b   : > { %1241 = dma.hbm_to_vmem [thread:$0]  (!%p1645_p11), %s1922_s5, 1024, %s253_s17, [#allocation9], %s1546_s29, %s1546_s29, %s1547_s10  }
  0x5c   : > { %s29_s1 = ssub.s32 %s1540_s27, %s1704_s18  ;;  %s32_s8 = sadd.s32 1, %s1536_s26 }
  0x5d   : > { %p30_p4 = scmp.eq.s32.totalorder %s29_s1, 0  ;;  %p39_p8 = scmp.ne.s32.totalorder %s1536_s26, %s1532_s25 }
  0x5e   : > { %p40_p13 = scmp.eq.s32.totalorder %s1540_s27, 0  ;;  %p1253_p6 = scmp.lt.s32.totalorder %s1540_s27, 2 }
  0x5f   : > { %s1732_s12 = scalar_select %p30_p4, %s1536_s26, %s32_s8  }
  0x60   : > { %p41_p10 = por %p40_p13, %p39_p8  ;;  %p1937_p3 = scmp.eq.s32.totalorder %s1615_s28, 1 }
  0x61   : > { %s269_s16 = sand.u32 1, %s1536_s26   ;;  %s1053_s19 = sshll.u32 %s1540_s27, 7 }
  0x62   : > { %p1736_p5 = por %p1937_p3, %p39_p8  ;;  %s1052_s21 = sshll.u32 %s269_s16, 3 }
  0x63   : > { %s1745_s29 = scalar_lea.hbm %s1917_s0, %s1053_s19  ;;  %s273_s10 = scalar_lea.vmem [#allocation2], %s1052_s21 }
  0x64   : > { %s280_s17 = sshll.u32 %s273_s10, 4  ;;  %p1747_p11 = pnand %p1253_p6, %p41_p10  ;;  %s1751_s17 = int_to_ptr.vmem [resolvable:$true] %s280_s17 }
  0x65   : > { %s270_s14 = scalar_lea.sflag [#allocation3], %s269_s16  ;;  %s1436_s13 = scalar_lea.hbm %s1745_s29, 128 }
  0x66   : > { %p1437_p7 = scmp.ne.s32.totalorder %s1745_s29, %s1436_s13  ;;  %p1438_p9 = pneg %p1747_p11 }
  0x67   : > { %s1441_s8 = scalar_lea.hbm %s1917_s0, 256  ;;  %p1442_p2 = scmp.lt.u32.totalorder %s1745_s29, %s1917_s0 }
  0x68   : > { %p1439_p12 = pnand %p1438_p9, %p1437_p7  ;;  %p1443_p1 = scmp.lt.u32.totalorder %s1441_s8, %s1436_s13 }
  0x69   : > { %p1445_p8 = scmp.lt.u32.totalorder %s1436_s13, %s1745_s29 }
  0x6a   : > { %p1440_p0 = pneg %p1439_p12  ;;  %p1444_p4 = por %p1443_p1, %p1442_p2 }
  0x6c   : > { %p1446_p13 = por %p1445_p8, %p1444_p4 }
  0x6e   : > { %p1447_p6 = pnand %p1446_p13, %p1440_p0 }
  0x70   : > { %1450 = shalt.err (!%p1447_p6)
}
  0x71   : > { %s1451_s16 = scalar_lea.vmem %s1751_s17, 128  ;;  %s1549_s22 = smov [#allocation2]  }
  0x72   : > { %p1452_p10 = scmp.ne.s32.totalorder %s1751_s17, %s1451_s16  ;;  %s1456_s23 = sshll.u32 %s1549_s22, 4  ;;  %s1457_s23 = int_to_ptr.vmem [resolvable:$false] %s1456_s23 }
  0x73   : > { %s1458_s10 = scalar_lea.vmem %s1457_s23, 256  ;;  %p1459_p12 = scmp.lt.s32.totalorder %s1751_s17, %s1457_s23 }
  0x74   : > { %p1454_p3 = pnand %p1452_p10, %p1438_p9  ;;  %p1460_p2 = scmp.lt.s32.totalorder %s1458_s10, %s1451_s16 }
  0x76   : > { %p1455_p7 = pneg %p1454_p3  ;;  %p1461_p1 = por %p1460_p2, %p1459_p12 }
  0x78   : > { %p1462_p4 = pnand %p1461_p1, %p1455_p7 }
  0x7a   : > { %1465 = shalt.err (!%p1462_p4)
}
  0x7b   : > { %1245 = dma.hbm_to_vmem [thread:$0]  (!%p1747_p11), %s1745_s29, 128, %s1751_s17, %s270_s14  }
  0x7c   : > { %p1940_p0 = scmp.ne.s32.totalorder %s1933_s9, 0 }
  0x7d   : > { %s1781_s13 = sand.u32 (!%p1940_p0), 1, %s1532_s25   ;;  %p1941_p9 = scmp.ne.s32.totalorder (!%p1940_p0), %s1930_s30, 0 }
  0x7e   : > { %289 = sbr.rel (%p1940_p0) target bundleno = 1590 (0x636), region = 48  ;;  %s1055_s15 = sshll.u32 (!%p1940_p0), %s1781_s13, 3 }
  0x7f   : > { %s292_s1 = scalar_lea.sflag (!%p1940_p0), [#allocation3], %s1781_s13  ;;  %s1787_s8 = scalar_lea.vmem (!%p1940_p0), [#allocation2], %s1055_s15 }
  0x85   : > { %1511 = dma.done.wait (%p1941_p9), %s292_s1, 128  }
  0x86   : > { %1513 = vsyncadd (%p1941_p9), %s292_s1, 4294967168  ;;  %p1942_p11 = scmp.eq.s32.totalorder %s1615_s28, 0 }
  0x88   : > { %1515 = dma.done.wait (%p1942_p11), [#allocation6], 4096   ;;  %p1943_p8 = pmov %p1942_p11 }
  0x8a   : > { %1517 = vsyncadd (%p1943_p8), [#allocation6], 4294963200  ;;  %p1944_p13 = pmov %p1943_p8 }
  0x8b   : > { %p1945_p6 = pmov %p1943_p8 }
  0x8c   : > { %1519 = dma.done.wait (%p1944_p13), [#allocation9], 1024  }
  0x8d   : > { %1521 = vsyncadd (%p1945_p6), [#allocation9], 4294966272  ;;  %v1550_v0 = vmov 0   ;;  %v1300_v1 = vld [vmem:[#allocation5 + $0x4] ss:$12 sps:$4 sm:$0xff]   ;;  %vm340_vm0 = vcmask 261120   ;;  %v377_v21 = vlaneseq }
  0x8e   : > { %552 = vmatprep.mubr.bf16.mxu0 %v1550_v0  ;;  %v1302_v2 = vld [vmem:[#allocation5] ss:$12 sps:$4 sm:$0xff]   ;;  %520 = vmatprep.subr.bf16.mxu0 %v1300_v1  ;;  %v1303_v3 = vld [vmem:[#allocation5 + $0x1c] ss:$12 sps:$4 sm:$0xff]   ;;  %v1305_v4 = vld [vmem:[#allocation5 + $0x18] ss:$12 sps:$4 sm:$0xff]  }
  0x8f   : > { %521 = vmatpush1.bf16.msra.mxu0 %v1302_v2  ;;  %v1306_v5 = vld [vmem:[#allocation5 + $0x34] ss:$12 sps:$4 sm:$0xff]   ;;  %v1308_v6 = vld [vmem:[#allocation5 + $0x30] ss:$12 sps:$4 sm:$0xff]   ;;  %v1309_v7 = vld [vmem:[#allocation5 + $0x4c] ss:$12 sps:$4 sm:$0xff]  }
  0x90   : > { %522 = vmatprep.subr.bf16.mxu0 %v1303_v3  ;;  %v1311_v8 = vld [vmem:[#allocation5 + $0x48] ss:$12 sps:$4 sm:$0xff]   ;;  %v1312_v9 = vld [vmem:[#allocation5 + $0x64] ss:$12 sps:$4 sm:$0xff]   ;;  %v1314_v10 = vld [vmem:[#allocation5 + $0x60] ss:$12 sps:$4 sm:$0xff]  }
  0x91   : > { %v1315_v11 = vld [vmem:[#allocation5 + $0x7c] ss:$12 sps:$4 sm:$0xff]   ;;  %v1317_v12 = vld [vmem:[#allocation5 + $0x78] ss:$12 sps:$4 sm:$0xff]   ;;  %v1318_v13 = vld [vmem:[#allocation5 + $0x94] ss:$12 sps:$4 sm:$0xff]  }
  0x92   : > { %v1320_v14 = vld [vmem:[#allocation5 + $0x90] ss:$12 sps:$4 sm:$0xff]   ;;  %v1321_v15 = vld [vmem:[#allocation5 + $0xac] ss:$12 sps:$4 sm:$0xff]   ;;  %v1323_v16 = vld [vmem:[#allocation5 + $0xa8] ss:$12 sps:$4 sm:$0xff]  }
  0x93   : > { %523 = vmatpush1.bf16.msra.mxu0 %v1305_v4  ;;  %v1802_v17 = vld [vmem:[%s1787_s8] sm:$0xff]  ;;  %vm1808_vm1 = vmpackc.low %vm340_vm0, %vm340_vm0  ;;  %v1551_v20 = vmov 0.0   ;;  %vm1552_vm2 = vmmov 0   ;;  %v378_v22 = vshrl.u32 %v377_v21, 7  ;;  %v1325_v38 = vld [vmem:[#allocation5 + $0x20] ss:$12 sps:$4 sm:$0xff]  }
  0x94   : > { %524 = vmatprep.subr.bf16.mxu0 %v1306_v5  ;;  %v1085_v18 = vpack.c.bf16 %v1802_v17, %v1802_v17  ;;  %1144 = vmatprep.subr.bf16.mxu1 %v1551_v20  ;;  %v375_v24 = vld [vmem:[%s1919_s2] sm:$0x7]  ;;  %v1324_v37 = vld [vmem:[#allocation5 + $0x8] ss:$12 sps:$4 sm:$0xff]   ;;  %v1326_v39 = vld [vmem:[#allocation5 + $0x38] ss:$12 sps:$4 sm:$0xff]  }
  0x95   : > { %1160 = vmatprep.mubr.msk.bf16.mxu1 %vm1552_vm2, %v1551_v20  ;;  %v383_v23 = vsub.s32 1, %v378_v22  ;;  %v379_v25 = vsub.s32 0, %v378_v22  ;;  %1145 = vmatpush3.bf16.msra.mxu1 %v1324_v37  ;;  %v1327_v40 = vld [vmem:[#allocation5 + $0x50] ss:$12 sps:$4 sm:$0xff]   ;;  %v1328_v41 = vld [vmem:[#allocation5 + $0x68] ss:$12 sps:$4 sm:$0xff]  }
  0x96   : > { %1146 = vmatprep.subr.bf16.mxu1 %v1551_v20  ;;  %v1329_v42 = vld [vmem:[#allocation5 + $0x80] ss:$12 sps:$4 sm:$0xff]   ;;  %v1330_v43 = vld [vmem:[#allocation5 + $0x98] ss:$12 sps:$4 sm:$0xff]   ;;  %v1331_v44 = vld [vmem:[#allocation5 + $0xb0] ss:$12 sps:$4 sm:$0xff]  }
  0x97   : > { %525 = vmatpush1.bf16.msra.mxu0 %v1308_v6  ;;  %v384_v26 = vrot.slane %v375_v24, %v383_v23  ;;  %v380_v27 = vrot.slane %v375_v24, %v379_v25  ;;  %vm645_vm3 = vcmask 64512   ;;  %v387_v50 = vsub.s32 2, %v378_v22  ;;  %v1332_v0 = vld [vmem:[#allocation7] sm:$0xff]   ;;  %v1333_v1 = vld [vmem:[#allocation7 + $0x8] sm:$0xff]   ;;  %v1334_v2 = vld [vmem:[#allocation7 + $0x10] sm:$0xff]   ;;  %s1110_s19 = sshll.u32 %s1615_s28, 7 }
  0x98   : > { %526 = vmatprep.subr.bf16.mxu0 %v1309_v7  ;;  %vm661_vm4 = vcmask 1043456   ;;  %v1335_v3 = vld [vmem:[#allocation7 + $0x18] sm:$0xff]   ;;  %v1336_v4 = vld [vmem:[#allocation7 + $0x20] sm:$0xff]   ;;  %v1337_v5 = vld [vmem:[#allocation7 + $0x28] sm:$0xff]   ;;  %v341_v19 = vsel %vm340_vm0, %v1802_v17, 0.0  ;;  %s337_s21 = scalar_lea.vmem [#allocation10], %s1055_s15  ;;  %s1872_s10 = scalar_lea.hbm %s1924_s7, %s1110_s19 }
  0x99   : > { %1147 = vmatpush3.bf16.msra.mxu1 %v1325_v38  ;;  %v388_v51 = vrot.slane %v375_v24, %v387_v50  ;;  %v1338_v6 = vld [vmem:[#allocation7 + $0x30] sm:$0xff]   ;;  %s947_s16 = sshll.u32 %s337_s21, 4  ;;  %s934_s28 = scalar_lea.sflag [#allocation4], %s1781_s13  ;;  %s1874_s16 = int_to_ptr.vmem [resolvable:$true] %s947_s16 }
  0x9a   : > { %1148 = vmatprep.subr.bf16.mxu1 %v1551_v20  ;;  %s1466_s15 = scalar_lea.vmem %s1874_s16, 128  ;;  %s1553_s1 = smov [#allocation10]  }
  0x9b   : > { %527 = vmatpush1.bf16.msra.mxu0 %v1311_v8  ;;  %p1467_p10 = scmp.ne.s32.totalorder %s1874_s16, %s1466_s15  ;;  %s1470_s8 = sshll.u32 %s1553_s1, 4  ;;  %s1471_s8 = int_to_ptr.vmem [resolvable:$false] %s1470_s8 }
  0x9c   : > { %528 = vmatprep.subr.bf16.mxu0 %v1312_v9  ;;  %s1472_s30 = scalar_lea.vmem %s1471_s8, 256  ;;  %p1473_p12 = scmp.lt.s32.totalorder %s1874_s16, %s1471_s8 }
  0x9d   : > { %1149 = vmatpush3.bf16.msra.mxu1 %v1326_v39  ;;  %p1468_p3 = pnand %p1467_p10, %p1736_p5  ;;  %p1474_p2 = scmp.lt.s32.totalorder %s1472_s30, %s1466_s15 }
  0x9e   : > { %1150 = vmatprep.subr.bf16.mxu1 %v1551_v20 }
  0x9f   : > { %529 = vmatpush1.bf16.msra.mxu0 %v1314_v10  ;;  %p1469_p7 = pneg %p1468_p3  ;;  %p1475_p1 = por %p1474_p2, %p1473_p12 }
  0xa0   : > { %530 = vmatprep.subr.bf16.mxu0 %v1315_v11  ;;  %v1339_v11 = vld [vmem:[#allocation7 + $0x38] sm:$0xff]  }
  0xa1   : > { %1151 = vmatpush3.bf16.msra.mxu1 %v1327_v40  ;;  %p1476_p4 = pnand %p1475_p1, %p1469_p7 }
  0xa2   : > { %1152 = vmatprep.subr.bf16.mxu1 %v1551_v20 }
  0xa3   : > { %531 = vmatpush1.bf16.msra.mxu0 %v1317_v12  ;;  %v1340_v12 = vld [vmem:[#allocation8] sm:$0xff]  }
  0xa4   : > { %532 = vmatprep.subr.bf16.mxu0 %v1318_v13  ;;  %v1341_v13 = vld [vmem:[#allocation8 + $0x8] sm:$0xff]  }
  0xa5   : > { %1153 = vmatpush3.bf16.msra.mxu1 %v1328_v41 }
  0xa6   : > { %1154 = vmatprep.subr.bf16.mxu1 %v1551_v20 }
  0xa7   : > { %533 = vmatpush1.bf16.msra.mxu0 %v1320_v14  ;;  %v1342_v14 = vld [vmem:[#allocation8 + $0x10] sm:$0xff]  }
  0xa8   : > { %534 = vmatprep.subr.bf16.mxu0 %v1321_v15  ;;  %v1343_v15 = vld [vmem:[#allocation8 + $0x18] sm:$0xff]  }
  0xa9   : > { %1155 = vmatpush3.bf16.msra.mxu1 %v1329_v42 }
  0xaa   : > { %1156 = vmatprep.subr.bf16.mxu1 %v1551_v20 }
  0xab   : > { %535 = vmatpush1.bf16.msra.mxu0 %v1323_v16  ;;  %v1344_v16 = vld [vmem:[#allocation8 + $0x20] sm:$0xff]  }
  0xac   : > { %1164 = vmatprep.subr.bf16.mxu0 %v1551_v20 }
  0xad   : > { %1157 = vmatpush3.bf16.msra.mxu1 %v1330_v43 }
  0xae   : > { %1086 = vmatmul.mubr.msk.bf16.vlgmr.msra.gmra.mrb[0].mxu0 %vm1808_vm1, %v1085_v18  ;;  %1158 = vmatprep.subr.bf16.mxu1 %v1551_v20 }
  0xaf   : > { %1166 = vmatprep.mubr.msk.bf16.mxu0 %vm1552_vm2, %v1551_v20 }
  0xb1   : > { %1159 = vmatpush3.bf16.msra.mxu1 %v1331_v44 }
  0xb2   : > { %1170 = vmatprep.subr.bf16.mxu1 %v1551_v20 }
  0xb4   : > { %1161 = vmatmul.mubr.msk.bf16.vlgmr.msra.gmra.mrb[0].mxu1 %vm1808_vm1, %v1085_v18  ;;  %v1345_v18 = vld [vmem:[#allocation8 + $0x28] sm:$0xff]  }
  0xb5   : > { %1172 = vmatprep.mubr.msk.bf16.mxu1 %vm1552_vm2, %v1551_v20 }
 0x181   : > { %v554_v28 = vpop.f32.mrb[0].mxu0 }
 0x182   : > { %v556_v29 = vpop.f32.mrb[1].mxu0  ;;  %v555_v32 = vadd.f32 %v554_v28, %v380_v27  ;;  %v1346_v27 = vld [vmem:[#allocation8 + $0x30] sm:$0xff]   ;;  %v1347_v28 = vld [vmem:[#allocation8 + $0x38] sm:$0xff]  }
 0x183   : > { %v557_v30 = vadd.f32 %v556_v29, %v384_v26  ;;  %v558_v31 = vpop.f32.mrb[2].mxu0  ;;  %v1091_v29 = vld [vmem:[%s1921_s4] ss:$0 sm:$0xff] }
 0x184   : > { %v559_v33 = vpop.f32.mrb[3].mxu0  ;;  %v601_v35 = vmul.f32 0.17677669, %v555_v32 }
 0x185   : > { %v603_v34 = vpack.c.bf16 %v557_v30, %v557_v30 }
 0x186   : > { %v602_v36 = vpack.c.bf16 %v601_v35, %v601_v35 }
 0x187   : > { %1165 = vmatpush3.bf16.xpose.msra.mxu0 %v603_v34  ;;  %v595_v52 = vpop.f32.mrb[0].mxu1 }
 0x188   : > { %1176 = vmatprep.subr.bf16.mxu0 %v1551_v20  ;;  %v596_v53 = vadd.f32 %v595_v52, %v388_v51  ;;  %v1162_v54 = vpop.f32.mrb[1].mxu1 }
 0x189   : > { %v598_v55 = vpop.f32.mrb[2].mxu1 }
 0x18a   : > { %v604_v56 = vpack.c.bf16 %v596_v53, %v596_v53  ;;  %v1163_v57 = vpop.f32.mrb[3].mxu1 }
 0x18c   : > { %v663_v58 = vsel %vm661_vm4, %v604_v56, 0 }
 0x18d   : > { %1171 = vmatpush3.bf16.msra.mxu1 %v663_v58 }
 0x18e   : > { %1167 = vmatmul.mubr.bf16.vlgmr.msra.gmra.mrb[4].mxu0 %v602_v36  ;;  %1196 = vmatprep.subr.bf16.mxu1 %v1551_v20  ;;  %v1100_v36 = vld [vmem:[%s1923_s6] ss:$0 sm:$0xff] }
 0x18f   : > { %1192 = vmatprep.mubr.msk.bf16.mxu0 %vm1552_vm2, %v1551_v20  ;;  %1177 = vmatpush3.bf16.msra.mxu0 %v1332_v0 }
 0x190   : > { %1178 = vmatprep.subr.bf16.mxu0 %v1551_v20 }
 0x193   : > { %1179 = vmatpush3.bf16.msra.mxu0 %v1333_v1 }
 0x194   : > { %1180 = vmatprep.subr.bf16.mxu0 %v1551_v20 }
 0x197   : > { %1181 = vmatpush3.bf16.msra.mxu0 %v1334_v2 }
 0x198   : > { %1182 = vmatprep.subr.bf16.mxu0 %v1551_v20 }
 0x19b   : > { %1183 = vmatpush3.bf16.msra.mxu0 %v1335_v3 }
 0x19c   : > { %1184 = vmatprep.subr.bf16.mxu0 %v1551_v20 }
 0x19f   : > { %1185 = vmatpush3.bf16.msra.mxu0 %v1336_v4 }
 0x1a0   : > { %1186 = vmatprep.subr.bf16.mxu0 %v1551_v20 }
 0x1a3   : > { %1187 = vmatpush3.bf16.msra.mxu0 %v1337_v5 }
 0x1a4   : > { %1188 = vmatprep.subr.bf16.mxu0 %v1551_v20 }
 0x1a7   : > { %1189 = vmatpush3.bf16.msra.mxu0 %v1338_v6 }
 0x1a8   : > { %1190 = vmatprep.subr.bf16.mxu0 %v1551_v20 }
 0x1ab   : > { %1191 = vmatpush3.bf16.msra.mxu0 %v1339_v11 }
 0x261   : > { %v639_v45 = vpop.f32.mrb[4].mxu0 }
 0x262   : > { %v1168_v46 = vpop.f32.mrb[5].mxu0  ;;  %v646_v47 = vsel %vm645_vm3, %v639_v45, -inf }
 0x263   : > { %647 = vmax.xlane.f32.xlu0 %v646_v47  ;;  %v642_v48 = vpop.f32.mrb[6].mxu0 }
 0x264   : > { %v1169_v49 = vpop.f32.mrb[7].mxu0 }
 0x2f0   : > { %v648_v59 = vpop.xlane.xlu0 %647 }
 0x2f1   : > { %v649_v60 = vsub.f32 %v639_v45, %v648_v59 }
 0x2f3   : > { %v650_v61 = vmul.f32 1.442695, %v649_v60 }
 0x2f5   : > { %1348 = vpow2.f32 %v650_v61 }
 0x2ff   : > { %v1349_v62 = vpop.eup %1348 }
 0x300   : > { %v652_v63 = vsel %vm645_vm3, %v1349_v62, 0.0 }
 0x301   : > { %653 = vadd.xlane.f32.xlu0 %v652_v63 }
 0x38e   : > { %v654_v7 = vpop.xlane.xlu0 %653 }
 0x38f   : > { %1350 = vrcp.f32 %v654_v7 }
 0x399   : > { %v1351_v8 = vpop.eup %1350 }
 0x39a   : > { %v656_v9 = vmul.f32 %v1351_v8, %v1349_v62 }
 0x39c   : > { %v657_v10 = vpack.c.bf16 %v656_v9, %v656_v9 }
 0x39e   : > { %1173 = vmatmul.mubr.msk.bf16.vlgmr.msra.gmra.mrb[4].mxu1 %vm645_vm3, %v657_v10 }
 0x39f   : > { %1212 = vmatprep.mubr.msk.bf16.mxu1 %vm1552_vm2, %v1551_v20  ;;  %1197 = vmatpush3.bf16.msra.mxu1 %v1340_v12 }
 0x3a0   : > { %1198 = vmatprep.subr.bf16.mxu1 %v1551_v20 }
 0x3a3   : > { %1199 = vmatpush3.bf16.msra.mxu1 %v1341_v13 }
 0x3a4   : > { %1200 = vmatprep.subr.bf16.mxu1 %v1551_v20 }
 0x3a7   : > { %1201 = vmatpush3.bf16.msra.mxu1 %v1342_v14 }
 0x3a8   : > { %1202 = vmatprep.subr.bf16.mxu1 %v1551_v20 }
 0x3ab   : > { %1203 = vmatpush3.bf16.msra.mxu1 %v1343_v15 }
 0x3ac   : > { %1204 = vmatprep.subr.bf16.mxu1 %v1551_v20 }
 0x3af   : > { %1205 = vmatpush3.bf16.msra.mxu1 %v1344_v16 }
 0x3b0   : > { %1206 = vmatprep.subr.bf16.mxu1 %v1551_v20 }
 0x3b3   : > { %1207 = vmatpush3.bf16.msra.mxu1 %v1345_v18 }
 0x3b4   : > { %1208 = vmatprep.subr.bf16.mxu1 %v1551_v20 }
 0x3b7   : > { %1209 = vmatpush3.bf16.msra.mxu1 %v1346_v27 }
 0x3b8   : > { %1210 = vmatprep.subr.bf16.mxu1 %v1551_v20 }
 0x3bb   : > { %1211 = vmatpush3.bf16.msra.mxu1 %v1347_v28 }
 0x471   : > { %v699_v21 = vpop.f32.mrb[4].mxu1 }
 0x472   : > { %v705_v22 = vadd.f32 %v699_v21, %v341_v19  ;;  %v1174_v23 = vpop.f32.mrb[5].mxu1 }
 0x473   : > { %v702_v24 = vpop.f32.mrb[6].mxu1 }
 0x474   : > { %v706_v25 = vpack.c.bf16 %v705_v22, %v705_v22  ;;  %v1175_v26 = vpop.f32.mrb[7].mxu1 }
 0x476   : > { %1193 = vmatmul.mubr.bf16.vlgmr.msra.gmra.mrb[8].mxu0 %v706_v25 }
 0x549   : > { %v812_v17 = vpop.f32.mrb[8].mxu0 }
 0x54a   : > { %v813_v30 = vadd.f32 %v1091_v29, %v812_v17  ;;  %v1194_v31 = vpop.f32.mrb[9].mxu0 }
 0x54b   : > { %v815_v32 = vpop.f32.mrb[10].mxu0 }
 0x54c   : > { %v818_v33 = vmax.f32 %v813_v30, 0.0  ;;  %v1195_v34 = vpop.f32.mrb[11].mxu0 }
 0x54e   : > { %v819_v35 = vpack.c.bf16 %v818_v33, %v818_v33 }
 0x550   : > { %1213 = vmatmul.mubr.bf16.vlgmr.msra.gmra.mrb[8].mxu1 %v819_v35 }
 0x623   : > { %v925_v20 = vpop.f32.mrb[8].mxu1 }
 0x624   : > { %v926_v37 = vadd.f32 %v1100_v36, %v925_v20  ;;  %v1214_v38 = vpop.f32.mrb[9].mxu1 }
 0x625   : > { %v928_v39 = vpop.f32.mrb[10].mxu1 }
 0x626   : > { %v931_v40 = vadd.f32 %v926_v37, %v705_v22  ;;  %v1215_v41 = vpop.f32.mrb[11].mxu1 }
 0x628   : > { %932 = vst.msk [vmem:[%s337_s21] sm:$0xff] %vm340_vm0, %v931_v40 }
 0x629   : > { %1479 = shalt.err (!%p1476_p4)
}
 0x62a   : > { %s1480_s13 = scalar_lea.hbm %s1872_s10, 128  ;;  %s1484_s17 = scalar_lea.hbm %s1924_s7, 256 }
 0x62b   : > { %p1481_p0 = scmp.ne.s32.totalorder %s1872_s10, %s1480_s13  ;;  %p1485_p8 = scmp.lt.u32.totalorder %s1872_s10, %s1924_s7 }
 0x62c   : > { %p1486_p13 = scmp.lt.u32.totalorder %s1484_s17, %s1480_s13  ;;  %p1488_p10 = scmp.lt.u32.totalorder %s1480_s13, %s1872_s10 }
 0x62d   : > { %p1482_p9 = pnand %p1481_p0, %p1736_p5 }
 0x62e   : > { %p1487_p6 = por %p1486_p13, %p1485_p8 }
 0x62f   : > { %p1483_p11 = pneg %p1482_p9 }
 0x630   : > { %p1489_p3 = por %p1488_p10, %p1487_p6 }
 0x632   : > { %p1490_p7 = pnand %p1489_p3, %p1483_p11 }
 0x634   : > { %1493 = shalt.err (!%p1490_p7)
}
 0x635   : > { %1230 = dma.vmem_to_hbm [thread:$0]  (%p1736_p5), %s1874_s16, 128, %s1872_s10, %s934_s28  }
 0x636 PF: > { %s1948_s19 = sld [smem:[#allocation15_spill]]  ;;  %s959_s21 = sand.u32 1, %s1528_s24  }
 0x637   : > { %p1950_p2 = scmp.ge.s32.totalorder %s1540_s27, 2  ;;  %s960_s22 = scalar_lea.sflag [#allocation4], %s959_s21 }
 0x63c   : > { %p1949_p12 = scmp.ne.s32.totalorder %s1948_s19, 0 }
 0x63e   : > { %p1247_p1 = pnand %p1950_p2, %p1949_p12 }
 0x640   : > { %1523 = dma.done.wait (!%p1247_p1), %s960_s22, 128  }
 0x641   : > { %1525 = vsyncadd (!%p1247_p1), %s960_s22, 4294967168  ;;  %p22_p4 = scmp.ge.s32.totalorder %s1704_s18, 4   ;;  %s1951_s24 = smov %s1532_s25 }
 0x642   : > { %s1952_s25 = smov %s1536_s26  ;;  %s1953_s26 = smov %s1732_s12 }
 0x643   : > { %s1954_s27 = smov %s1704_s18  ;;  %24 = sbr.rel (!%p22_p4) target bundleno = 9 (0x9), region = 105 }
 0x64a   :  { %965 = vsyncpa [#allocation3], 1 }
 0x64b   :  { %967 = vsyncpa [#allocation3 + $0x1], 1 }
 0x64c   :  { %968 = vsyncpa [#allocation6], 1 }
 0x64d   :  { %969 = vsyncpa [#allocation9], 1 }
 0x64e   :  { %970 = vsyncpa [#allocation4], 1 }
 0x64f   :  { %972 = vsyncpa [#allocation4 + $0x1], 1 }

</bundles_post_ra>
